<compile_context>
chip_gen: v5e
topology: v5e:2x2
jax: 0.10.0
libtpu: 0.0.40
codegen_flags: <defaults>
</compile_context>

<pallas_src>
import functools

import jax
import jax.numpy as jnp
from jax.experimental import pallas as pl
from jax.experimental.pallas import tpu as pltpu


def _round_up(x, m):
    return ((x + m - 1) // m) * m


# ---------------------------------------------------------------------------
# Kernels
# ---------------------------------------------------------------------------
def _outconv_mxu_kernel(x_ref, w_ref, b_ref, o_ref, *, apply_sigmoid):
    """General path: full C_in contraction on the MXU.

    x_ref: (C_in, T_pix)   lane-dense pixel tile (VMEM)
    w_ref: (C_out, C_in)   full weight, resident (VMEM)
    b_ref: (C_out, 1)      bias column, resident (VMEM)
    o_ref: (C_out, T_pix)  lane-dense output tile (VMEM)
    """
    x = x_ref[...].astype(jnp.float32)
    w = w_ref[...].astype(jnp.float32)
    b = b_ref[...].astype(jnp.float32)
    y = jax.lax.dot_general(
        w, x, (((1,), (0,)), ((), ())), preferred_element_type=jnp.float32)
    y = y + b
    if apply_sigmoid:
        y = jax.nn.sigmoid(y)
    o_ref[...] = y.astype(o_ref.dtype)


def _outconv_vpu_kernel(x_ref, w_ref, b_ref, o_ref, *, apply_sigmoid, c_in, c_out):
    """Tiny-channel path: sublane-packed pixels, scalar-splat weights.

    x_ref: (C_in, S, 128)  VMEM — fully dense (8,128) vregs over pixels
    w_ref: (C_out, C_in)   SMEM — scalar reads, splat onto the slab
    b_ref: (C_out,)        SMEM — scalar reads
    o_ref: (C_out, S, 128) VMEM
    """
    for o in range(c_out):
        acc = x_ref[0].astype(jnp.float32) * w_ref[o, 0]
        for c in range(1, c_in):
            acc = acc + x_ref[c].astype(jnp.float32) * w_ref[o, c]
        acc = acc + b_ref[o]
        if apply_sigmoid:
            acc = jax.nn.sigmoid(acc)
        o_ref[o] = acc.astype(o_ref.dtype)


# ---------------------------------------------------------------------------
# Wrapper
# ---------------------------------------------------------------------------
def _vmem_budgets():
    """(double-buffered block budget, vmem_limit_bytes) per TPU generation."""
    try:
        cap = int(pltpu.get_tpu_info().vmem_capacity_bytes)
    except Exception:
        cap = 0
    if cap >= 128 * 1024 * 1024:          # v5e / v6e: 128 MiB physical VMEM
        return 28 * 1024 * 1024, 64 * 1024 * 1024
    # v7x (64 MiB per TensorCore) or unknown: stay conservative.
    return 16 * 1024 * 1024, 40 * 1024 * 1024


def outconv_forward(x_nchw, weight, bias, sig):
    """nn.Conv2d(in_ch, out_ch, 1) (+ optional Sigmoid) forward pass.

    x_nchw : (N, C_in, H, W)
    weight : (C_out, C_in, 1, 1)  (PyTorch conv weight layout)
    bias   : (C_out,)
    sig    : bool (static) — apply sigmoid if True
    returns (N, C_out, H, W), dtype of x
    """
    N, C_in, H, W = x_nchw.shape
    C_out = weight.shape[0]
    HW = H * W
    ebytes = jnp.dtype(x_nchw.dtype).itemsize

    w_mat = weight.reshape(C_out, C_in).astype(jnp.float32)
    b_vec = bias.reshape(C_out).astype(jnp.float32)

    budget_bytes, vmem_limit = _vmem_budgets()
    apply_sigmoid = bool(sig)

    # Sublane-packed VPU path only when one channel dim is tiny (would be
    # sublane-sparse in a (C, T_pix) layout) AND the unrolled C_in*C_out MACs
    # stay safely under the HBM roofline even on v7x (3.2 TB/s).
    use_vpu_packed = (
        HW % 128 == 0
        and min(C_in, C_out) < 8
        and C_in * C_out <= 2 * (C_in + C_out)
    )

    if use_vpu_packed:
        ST = HW // 128                                   # sublane rows of pixels
        # Honest double-buffered footprint: (C_in + C_out) slabs of (S,128) f32.
        row_bytes = 2 * ebytes * (C_in + C_out) * 128
        s_fit = budget_bytes // row_bytes
        if s_fit >= ST:
            s_blk = ST                                   # whole pixel axis per step
        else:
            s_blk = max(8, (s_fit // 8) * 8)             # (8,128)-legal tile
        # v7x megacore: guarantee >= 2 pixel tiles when there is only one image.
        if N == 1 and s_blk == ST and ST > 16:
            s_blk = _round_up(pl.cdiv(ST, 2), 8)

        x4 = x_nchw.reshape(N, C_in, ST, 128)            # free row-major reshape
        grid = (N, pl.cdiv(ST, s_blk))
        kernel = functools.partial(
            _outconv_vpu_kernel, apply_sigmoid=apply_sigmoid,
            c_in=C_in, c_out=C_out)

        out4 = pl.pallas_call(
            kernel,
            out_shape=jax.ShapeDtypeStruct((N, C_out, ST, 128), x_nchw.dtype),
            grid_spec=pltpu.PrefetchScalarGridSpec(
                num_scalar_prefetch=0,
                grid=grid,
                in_specs=[
                    # activations: batch squeezed, channels x (sublane,lane) slab
                    pl.BlockSpec((None, C_in, s_blk, 128),
                                 lambda n, p: (n, 0, p, 0)),
                    # weight + bias as SMEM scalars (splat in-kernel)
                    pl.BlockSpec(memory_space=pltpu.MemorySpace.SMEM),
                    pl.BlockSpec(memory_space=pltpu.MemorySpace.SMEM),
                ],
                out_specs=pl.BlockSpec((None, C_out, s_blk, 128),
                                       lambda n, p: (n, 0, p, 0)),
            ),
            compiler_params=pltpu.CompilerParams(
                dimension_semantics=("parallel", "parallel"),
                vmem_limit_bytes=vmem_limit,
            ),
        )(x4, w_mat, b_vec)
        return out4.reshape(N, C_out, H, W)

    # ----------------------- general MXU path ------------------------------
    x3 = x_nchw.reshape(N, C_in, HW)                     # free reshape
    b_mat = b_vec.reshape(C_out, 1)

    # Honest double-buffered footprint including (8,128) sublane padding.
    col_bytes = 2 * ebytes * (_round_up(C_in, 8) + _round_up(C_out, 8))
    t_fit = budget_bytes // col_bytes
    if t_fit >= HW:
        t_pix = HW                                       # whole pixel axis per step
    else:
        t_pix = max(128, (t_fit // 256) * 256)           # lane-dense tile
    # v7x megacore: guarantee >= 2 pixel tiles when there is only one image.
    if N == 1 and t_pix == HW and HW > 512:
        t_pix = _round_up(pl.cdiv(HW, 2), 256)

    grid = (N, pl.cdiv(HW, t_pix))
    kernel = functools.partial(_outconv_mxu_kernel, apply_sigmoid=apply_sigmoid)

    out3 = pl.pallas_call(
        kernel,
        out_shape=jax.ShapeDtypeStruct((N, C_out, HW), x_nchw.dtype),
        grid_spec=pltpu.PrefetchScalarGridSpec(
            num_scalar_prefetch=0,
            grid=grid,
            in_specs=[
                pl.BlockSpec((None, C_in, t_pix), lambda n, p: (n, 0, p)),
                pl.BlockSpec((C_out, C_in), lambda n, p: (0, 0)),   # resident
                pl.BlockSpec((C_out, 1), lambda n, p: (0, 0)),      # resident
            ],
            out_specs=pl.BlockSpec((None, C_out, t_pix), lambda n, p: (n, 0, p)),
        ),
        compiler_params=pltpu.CompilerParams(
            dimension_semantics=("parallel", "parallel"),
            vmem_limit_bytes=vmem_limit,
        ),
    )(x3, w_mat, b_mat)
    return out3.reshape(N, C_out, H, W)


def init_outconv_params(key, in_ch, out_ch):
    """Deterministic Conv2d(in_ch, out_ch, 1) init (Kaiming-uniform-like)."""
    kw, kb = jax.random.split(key)
    bound = 1.0 / jnp.sqrt(in_ch)                        # 1x1 kernel: fan_in = in_ch
    weight = jax.random.uniform(
        kw, (out_ch, in_ch, 1, 1), jnp.float32, minval=-bound, maxval=bound)
    bias = jax.random.uniform(
        kb, (out_ch,), jnp.float32, minval=-bound, maxval=bound)
    return weight, bias


if __name__ == "__main__":
    key = jax.random.PRNGKey(0)
    k_x1, k_p1, k_x2, k_p2 = jax.random.split(key, 4)

    def reference(x, weight, bias, sig):
        out_ch, in_ch = weight.shape[0], weight.shape[1]
        y = jnp.einsum("nchw,oc->nohw", x, weight.reshape(out_ch, in_ch))
        y = y + bias.reshape(1, out_ch, 1, 1)
        return jax.nn.sigmoid(y) if sig else y

    # Case 1: tiny channels (sublane-packed VPU path) + sigmoid.
    N, in_ch, out_ch, H, W = 2, 4, 3, 16, 16
    x1 = jax.random.normal(k_x1, (N, in_ch, H, W), jnp.float32)
    w1, b1 = init_outconv_params(k_p1, in_ch, out_ch)
    y1 = jax.block_until_ready(outconv_forward(x1, w1, b1, True))
    assert y1.shape == (N, out_ch, H, W)
    assert jnp.allclose(y1, reference(x1, w1, b1, True), atol=1e-5, rtol=1e-5)

    # Case 2: wider channels (MXU path), no sigmoid.  Loose tolerance: the MXU
    # may evaluate the f32 contraction with bf16 passes at default precision.
    N2, in_ch2, out_ch2 = 2, 32, 8
    x2 = jax.random.normal(k_x2, (N2, in_ch2, H, W), jnp.float32)
    w2, b2 = init_outconv_params(k_p2, in_ch2, out_ch2)
    y2 = jax.block_until_ready(outconv_forward(x2, w2, b2, False))
    assert y2.shape == (N2, out_ch2, H, W)
    assert jnp.allclose(y2, reference(x2, w2, b2, False), atol=5e-2, rtol=5e-2)

    print("KERNEL_OK")
</pallas_src>

<mosaic_0001>
module attributes {stable_mosaic.version = 11 : i64} {
  func.func @_outconv_vpu_kernel(%arg0: i32, %arg1: i32, %arg2: memref<1x4x2x128xf32, #tpu.memory_space<vmem>>, %arg3: memref<3x4xf32, #tpu.memory_space<smem>>, %arg4: memref<3xf32, #tpu.memory_space<smem>>, %arg5: memref<1x3x2x128xf32, #tpu.memory_space<vmem>>) attributes {dimension_semantics = [#tpu.dimension_semantics<parallel>, #tpu.dimension_semantics<parallel>], iteration_bounds = array<i64: 2, 1>, scalar_prefetch = 0 : i64, scratch_operands = 0 : i64, tpu.core_type = #tpu.core_type<tc>, window_params = [{transform_indices = @transform_0, window_bounds = array<i64: 1, 4, 2, 128>}, {transform_indices = @transform_1, window_bounds = array<i64: 3, 4>}, {transform_indices = @transform_2, window_bounds = array<i64: 3>}, {transform_indices = @transform_3, window_bounds = array<i64: 1, 3, 2, 128>}]} {
    %c0 = arith.constant 0 : index
    %c0_0 = arith.constant 0 : index
    %c0_1 = arith.constant 0 : index
    %c0_2 = arith.constant 0 : index
    %0 = vector.load %arg2[%c0, %c0_0, %c0_1, %c0_2] : memref<1x4x2x128xf32, #tpu.memory_space<vmem>>, vector<1x1x2x128xf32>
    %1 = vector.shape_cast %0 : vector<1x1x2x128xf32> to vector<2x128xf32>
    %c0_3 = arith.constant 0 : index
    %c0_4 = arith.constant 0 : index
    %2 = memref.load %arg3[%c0_3, %c0_4] : memref<3x4xf32, #tpu.memory_space<smem>>
    %3 = vector.broadcast %2 : f32 to vector<2x128xf32>
    %4 = arith.mulf %1, %3 : vector<2x128xf32>
    %c0_5 = arith.constant 0 : index
    %c1 = arith.constant 1 : index
    %c0_6 = arith.constant 0 : index
    %c0_7 = arith.constant 0 : index
    %5 = vector.load %arg2[%c0_5, %c1, %c0_6, %c0_7] : memref<1x4x2x128xf32, #tpu.memory_space<vmem>>, vector<1x1x2x128xf32>
    %6 = vector.shape_cast %5 : vector<1x1x2x128xf32> to vector<2x128xf32>
    %c0_8 = arith.constant 0 : index
    %c1_9 = arith.constant 1 : index
    %7 = memref.load %arg3[%c0_8, %c1_9] : memref<3x4xf32, #tpu.memory_space<smem>>
    %8 = vector.broadcast %7 : f32 to vector<2x128xf32>
    %9 = arith.mulf %6, %8 : vector<2x128xf32>
    %10 = arith.addf %4, %9 : vector<2x128xf32>
    %c0_10 = arith.constant 0 : index
    %c2 = arith.constant 2 : index
    %c0_11 = arith.constant 0 : index
    %c0_12 = arith.constant 0 : index
    %11 = vector.load %arg2[%c0_10, %c2, %c0_11, %c0_12] : memref<1x4x2x128xf32, #tpu.memory_space<vmem>>, vector<1x1x2x128xf32>
    %12 = vector.shape_cast %11 : vector<1x1x2x128xf32> to vector<2x128xf32>
    %c0_13 = arith.constant 0 : index
    %c2_14 = arith.constant 2 : index
    %13 = memref.load %arg3[%c0_13, %c2_14] : memref<3x4xf32, #tpu.memory_space<smem>>
    %14 = vector.broadcast %13 : f32 to vector<2x128xf32>
    %15 = arith.mulf %12, %14 : vector<2x128xf32>
    %16 = arith.addf %10, %15 : vector<2x128xf32>
    %c0_15 = arith.constant 0 : index
    %c3 = arith.constant 3 : index
    %c0_16 = arith.constant 0 : index
    %c0_17 = arith.constant 0 : index
    %17 = vector.load %arg2[%c0_15, %c3, %c0_16, %c0_17] : memref<1x4x2x128xf32, #tpu.memory_space<vmem>>, vector<1x1x2x128xf32>
    %18 = vector.shape_cast %17 : vector<1x1x2x128xf32> to vector<2x128xf32>
    %c0_18 = arith.constant 0 : index
    %c3_19 = arith.constant 3 : index
    %19 = memref.load %arg3[%c0_18, %c3_19] : memref<3x4xf32, #tpu.memory_space<smem>>
    %20 = vector.broadcast %19 : f32 to vector<2x128xf32>
    %21 = arith.mulf %18, %20 : vector<2x128xf32>
    %22 = arith.addf %16, %21 : vector<2x128xf32>
    %c0_20 = arith.constant 0 : index
    %23 = memref.load %arg4[%c0_20] : memref<3xf32, #tpu.memory_space<smem>>
    %24 = vector.broadcast %23 : f32 to vector<2x128xf32>
    %25 = arith.addf %22, %24 : vector<2x128xf32>
    %26 = arith.negf %25 : vector<2x128xf32>
    %27 = math.exp %26 : vector<2x128xf32>
    %cst = arith.constant 1.000000e+00 : f32
    %28 = vector.broadcast %cst : f32 to vector<2x128xf32>
    %29 = arith.addf %28, %27 : vector<2x128xf32>
    %30 = arith.divf %28, %29 : vector<2x128xf32>
    %c0_21 = arith.constant 0 : index
    %c0_22 = arith.constant 0 : index
    %c0_23 = arith.constant 0 : index
    %c0_24 = arith.constant 0 : index
    %31 = vector.load %arg5[%c0_21, %c0_22, %c0_23, %c0_24] : memref<1x3x2x128xf32, #tpu.memory_space<vmem>>, vector<1x1x2x128xf32>
    %32 = vector.shape_cast %31 : vector<1x1x2x128xf32> to vector<2x128xf32>
    %33 = vector.shape_cast %30 : vector<2x128xf32> to vector<1x1x2x128xf32>
    tpu.vector_store %arg5[%c0_21, %c0_22, %c0_23, %c0_24], %33 {strides = array<i32>} : memref<1x3x2x128xf32, #tpu.memory_space<vmem>>, vector<1x1x2x128xf32>,
    %c0_25 = arith.constant 0 : index
    %c0_26 = arith.constant 0 : index
    %c0_27 = arith.constant 0 : index
    %c0_28 = arith.constant 0 : index
    %34 = vector.load %arg2[%c0_25, %c0_26, %c0_27, %c0_28] : memref<1x4x2x128xf32, #tpu.memory_space<vmem>>, vector<1x1x2x128xf32>
    %35 = vector.shape_cast %34 : vector<1x1x2x128xf32> to vector<2x128xf32>
    %c1_29 = arith.constant 1 : index
    %c0_30 = arith.constant 0 : index
    %36 = memref.load %arg3[%c1_29, %c0_30] : memref<3x4xf32, #tpu.memory_space<smem>>
    %37 = vector.broadcast %36 : f32 to vector<2x128xf32>
    %38 = arith.mulf %35, %37 : vector<2x128xf32>
    %c0_31 = arith.constant 0 : index
    %c1_32 = arith.constant 1 : index
    %c0_33 = arith.constant 0 : index
    %c0_34 = arith.constant 0 : index
    %39 = vector.load %arg2[%c0_31, %c1_32, %c0_33, %c0_34] : memref<1x4x2x128xf32, #tpu.memory_space<vmem>>, vector<1x1x2x128xf32>
    %40 = vector.shape_cast %39 : vector<1x1x2x128xf32> to vector<2x128xf32>
    %c1_35 = arith.constant 1 : index
    %c1_36 = arith.constant 1 : index
    %41 = memref.load %arg3[%c1_35, %c1_36] : memref<3x4xf32, #tpu.memory_space<smem>>
    %42 = vector.broadcast %41 : f32 to vector<2x128xf32>
    %43 = arith.mulf %40, %42 : vector<2x128xf32>
    %44 = arith.addf %38, %43 : vector<2x128xf32>
    %c0_37 = arith.constant 0 : index
    %c2_38 = arith.constant 2 : index
    %c0_39 = arith.constant 0 : index
    %c0_40 = arith.constant 0 : index
    %45 = vector.load %arg2[%c0_37, %c2_38, %c0_39, %c0_40] : memref<1x4x2x128xf32, #tpu.memory_space<vmem>>, vector<1x1x2x128xf32>
    %46 = vector.shape_cast %45 : vector<1x1x2x128xf32> to vector<2x128xf32>
    %c1_41 = arith.constant 1 : index
    %c2_42 = arith.constant 2 : index
    %47 = memref.load %arg3[%c1_41, %c2_42] : memref<3x4xf32, #tpu.memory_space<smem>>
    %48 = vector.broadcast %47 : f32 to vector<2x128xf32>
    %49 = arith.mulf %46, %48 : vector<2x128xf32>
    %50 = arith.addf %44, %49 : vector<2x128xf32>
    %c0_43 = arith.constant 0 : index
    %c3_44 = arith.constant 3 : index
    %c0_45 = arith.constant 0 : index
    %c0_46 = arith.constant 0 : index
    %51 = vector.load %arg2[%c0_43, %c3_44, %c0_45, %c0_46] : memref<1x4x2x128xf32, #tpu.memory_space<vmem>>, vector<1x1x2x128xf32>
    %52 = vector.shape_cast %51 : vector<1x1x2x128xf32> to vector<2x128xf32>
    %c1_47 = arith.constant 1 : index
    %c3_48 = arith.constant 3 : index
    %53 = memref.load %arg3[%c1_47, %c3_48] : memref<3x4xf32, #tpu.memory_space<smem>>
    %54 = vector.broadcast %53 : f32 to vector<2x128xf32>
    %55 = arith.mulf %52, %54 : vector<2x128xf32>
    %56 = arith.addf %50, %55 : vector<2x128xf32>
    %c1_49 = arith.constant 1 : index
    %57 = memref.load %arg4[%c1_49] : memref<3xf32, #tpu.memory_space<smem>>
    %58 = vector.broadcast %57 : f32 to vector<2x128xf32>
    %59 = arith.addf %56, %58 : vector<2x128xf32>
    %60 = arith.negf %59 : vector<2x128xf32>
    %61 = math.exp %60 : vector<2x128xf32>
    %cst_50 = arith.constant 1.000000e+00 : f32
    %62 = vector.broadcast %cst_50 : f32 to vector<2x128xf32>
    %63 = arith.addf %62, %61 : vector<2x128xf32>
    %64 = arith.divf %62, %63 : vector<2x128xf32>
    %c0_51 = arith.constant 0 : index
    %c1_52 = arith.constant 1 : index
    %c0_53 = arith.constant 0 : index
    %c0_54 = arith.constant 0 : index
    %65 = vector.load %arg5[%c0_51, %c1_52, %c0_53, %c0_54] : memref<1x3x2x128xf32, #tpu.memory_space<vmem>>, vector<1x1x2x128xf32>
    %66 = vector.shape_cast %65 : vector<1x1x2x128xf32> to vector<2x128xf32>
    %67 = vector.shape_cast %64 : vector<2x128xf32> to vector<1x1x2x128xf32>
    tpu.vector_store %arg5[%c0_51, %c1_52, %c0_53, %c0_54], %67 {strides = array<i32>} : memref<1x3x2x128xf32, #tpu.memory_space<vmem>>, vector<1x1x2x128xf32>,
    %c0_55 = arith.constant 0 : index
    %c0_56 = arith.constant 0 : index
    %c0_57 = arith.constant 0 : index
    %c0_58 = arith.constant 0 : index
    %68 = vector.load %arg2[%c0_55, %c0_56, %c0_57, %c0_58] : memref<1x4x2x128xf32, #tpu.memory_space<vmem>>, vector<1x1x2x128xf32>
    %69 = vector.shape_cast %68 : vector<1x1x2x128xf32> to vector<2x128xf32>
    %c2_59 = arith.constant 2 : index
    %c0_60 = arith.constant 0 : index
    %70 = memref.load %arg3[%c2_59, %c0_60] : memref<3x4xf32, #tpu.memory_space<smem>>
    %71 = vector.broadcast %70 : f32 to vector<2x128xf32>
    %72 = arith.mulf %69, %71 : vector<2x128xf32>
    %c0_61 = arith.constant 0 : index
    %c1_62 = arith.constant 1 : index
    %c0_63 = arith.constant 0 : index
    %c0_64 = arith.constant 0 : index
    %73 = vector.load %arg2[%c0_61, %c1_62, %c0_63, %c0_64] : memref<1x4x2x128xf32, #tpu.memory_space<vmem>>, vector<1x1x2x128xf32>
    %74 = vector.shape_cast %73 : vector<1x1x2x128xf32> to vector<2x128xf32>
    %c2_65 = arith.constant 2 : index
    %c1_66 = arith.constant 1 : index
    %75 = memref.load %arg3[%c2_65, %c1_66] : memref<3x4xf32, #tpu.memory_space<smem>>
    %76 = vector.broadcast %75 : f32 to vector<2x128xf32>
    %77 = arith.mulf %74, %76 : vector<2x128xf32>
    %78 = arith.addf %72, %77 : vector<2x128xf32>
    %c0_67 = arith.constant 0 : index
    %c2_68 = arith.constant 2 : index
    %c0_69 = arith.constant 0 : index
    %c0_70 = arith.constant 0 : index
    %79 = vector.load %arg2[%c0_67, %c2_68, %c0_69, %c0_70] : memref<1x4x2x128xf32, #tpu.memory_space<vmem>>, vector<1x1x2x128xf32>
    %80 = vector.shape_cast %79 : vector<1x1x2x128xf32> to vector<2x128xf32>
    %c2_71 = arith.constant 2 : index
    %c2_72 = arith.constant 2 : index
    %81 = memref.load %arg3[%c2_71, %c2_72] : memref<3x4xf32, #tpu.memory_space<smem>>
    %82 = vector.broadcast %81 : f32 to vector<2x128xf32>
    %83 = arith.mulf %80, %82 : vector<2x128xf32>
    %84 = arith.addf %78, %83 : vector<2x128xf32>
    %c0_73 = arith.constant 0 : index
    %c3_74 = arith.constant 3 : index
    %c0_75 = arith.constant 0 : index
    %c0_76 = arith.constant 0 : index
    %85 = vector.load %arg2[%c0_73, %c3_74, %c0_75, %c0_76] : memref<1x4x2x128xf32, #tpu.memory_space<vmem>>, vector<1x1x2x128xf32>
    %86 = vector.shape_cast %85 : vector<1x1x2x128xf32> to vector<2x128xf32>
    %c2_77 = arith.constant 2 : index
    %c3_78 = arith.constant 3 : index
    %87 = memref.load %arg3[%c2_77, %c3_78] : memref<3x4xf32, #tpu.memory_space<smem>>
    %88 = vector.broadcast %87 : f32 to vector<2x128xf32>
    %89 = arith.mulf %86, %88 : vector<2x128xf32>
    %90 = arith.addf %84, %89 : vector<2x128xf32>
    %c2_79 = arith.constant 2 : index
    %91 = memref.load %arg4[%c2_79] : memref<3xf32, #tpu.memory_space<smem>>
    %92 = vector.broadcast %91 : f32 to vector<2x128xf32>
    %93 = arith.addf %90, %92 : vector<2x128xf32>
    %94 = arith.negf %93 : vector<2x128xf32>
    %95 = math.exp %94 : vector<2x128xf32>
    %cst_80 = arith.constant 1.000000e+00 : f32
    %96 = vector.broadcast %cst_80 : f32 to vector<2x128xf32>
    %97 = arith.addf %96, %95 : vector<2x128xf32>
    %98 = arith.divf %96, %97 : vector<2x128xf32>
    %c0_81 = arith.constant 0 : index
    %c2_82 = arith.constant 2 : index
    %c0_83 = arith.constant 0 : index
    %c0_84 = arith.constant 0 : index
    %99 = vector.load %arg5[%c0_81, %c2_82, %c0_83, %c0_84] : memref<1x3x2x128xf32, #tpu.memory_space<vmem>>, vector<1x1x2x128xf32>
    %100 = vector.shape_cast %99 : vector<1x1x2x128xf32> to vector<2x128xf32>
    %101 = vector.shape_cast %98 : vector<2x128xf32> to vector<1x1x2x128xf32>
    tpu.vector_store %arg5[%c0_81, %c2_82, %c0_83, %c0_84], %101 {strides = array<i32>} : memref<1x3x2x128xf32, #tpu.memory_space<vmem>>, vector<1x1x2x128xf32>,
    return
  }
  func.func @transform_0(%arg0: i32, %arg1: i32) -> (i32, i32, i32, i32) {
    %c0_i32 = arith.constant 0 : i32
    %c0_i32_0 = arith.constant 0 : i32
    %c0_i32_1 = arith.constant 0 : i32
    return %arg0, %c0_i32, %arg1, %c0_i32_0 : i32, i32, i32, i32
  }
  func.func @transform_1(%arg0: i32, %arg1: i32) -> (i32, i32) {
    %c0_i32 = arith.constant 0 : i32
    %c0_i32_0 = arith.constant 0 : i32
    %c0_i32_1 = arith.constant 0 : i32
    return %c0_i32, %c0_i32_0 : i32, i32
  }
  func.func @transform_2(%arg0: i32, %arg1: i32) -> i32 {
    %c0_i32 = arith.constant 0 : i32
    %c0_i32_0 = arith.constant 0 : i32
    return %c0_i32 : i32
  }
  func.func @transform_3(%arg0: i32, %arg1: i32) -> (i32, i32, i32, i32) {
    %c0_i32 = arith.constant 0 : i32
    %c0_i32_0 = arith.constant 0 : i32
    %c0_i32_1 = arith.constant 0 : i32
    return %arg0, %c0_i32, %arg1, %c0_i32_0 : i32, i32, i32, i32
  }
}

</mosaic_0001>

<bundles_post_ra>
// kernel: tpu_custom_call.1
= control target key start
LH: loop header
LB: loop body
LE: loop exit
PB: predicated region body
PF: predicated region fallthrough
CT: control target
= control target key end

     0   :  { %s994_s0 = inlined_call_operand.hbm [shape: f32[2,4,2,128], index: 0, kind: input, shape index: {}]   ;;  %s995_s1 = inlined_call_operand.hbm [shape: f32[3,4], index: 1, kind: input, shape index: {}]   ;;  %s996_s2 = inlined_call_operand.vmem [shape: f32[3], index: 2, kind: input, shape index: {}]   ;;  %s997_s3 = inlined_call_operand.hbm [shape: f32[2,3,2,128], index: 3, kind: output, shape index: {}]  }
   0x1   :  { %998 = sst [smem:[#allocation14_spill]] %s995_s1 }
   0x2   :  { %8 = vsyncpa [#allocation3], 0 }
   0x3   :  { %10 = vsyncpa [#allocation3 + $0x1], 0 }
   0x4   :  { %11 = vsyncpa [#allocation5], 0 }
   0x5   :  { %12 = vsyncpa [#allocation6], 0 }
   0x6   :  { %13 = vsyncpa [#allocation4], 0 }
   0x7   :  { %15 = vsyncpa [#allocation4 + $0x1], 0  ;;  %s815_s12 = smov 0   ;;  %s817_s13 = smov 0  }
   0x8   :  { %s819_s14 = smov 0   ;;  %s821_s15 = smov 0  }
   0x9   :  { %s823_s16 = smov 0   ;;  %s825_s17 = smov 0  }
   0xa LB: > { %s492_s18 = sadd.s32 4294967295, %s787_s17   ;;  %s493_s19 = sadd.s32 4294967294, %s787_s17   ;;  %s787_s17 = sphi %s825_s17, %s21_s17   ;;  %s783_s16 = sphi %s823_s16, %s1011_s16   ;;  %s779_s15 = sphi %s821_s15, %s1010_s15   ;;  %s775_s14 = sphi %s819_s14, %s1009_s14   ;;  %s771_s13 = sphi %s817_s13, %s1008_s13   ;;  %s767_s12 = sphi %s815_s12, %s1007_s12  }
   0xb   : > { %s42_s20 = sadd.s32 1, %s775_s14  ;;  %p49_p0 = scmp.ne.s32.totalorder %s775_s14, %s771_s13 }
   0xc   : > { %p50_p1 = scmp.eq.s32.totalorder %s787_s17, 0  ;;  %p55_p2 = scmp.ne.s32.totalorder %s771_s13, %s767_s12 }
   0xd   : > { %p853_p3 = scmp.eq.s32.totalorder %s492_s18, 0  ;;  %p123_p4 = scmp.eq.s32.totalorder %s492_s18, 1 }
   0xe   : > { %p857_p5 = por %p50_p1, %p49_p0  ;;  %p129_p6 = scmp.eq.s32.totalorder %s493_s19, 1 }
   0xf   : > { %p863_p7 = por %p853_p3, %p55_p2  ;;  %p867_p8 = por %p123_p4, %p49_p0 }
  0x10   : > { %p871_p9 = por %p129_p6, %p55_p2  ;;  %p494_p10 = scmp.ge.s32.totalorder %s787_s17, 1 }
  0x11   : > { %p136_p11 = scmp.lt.s32.totalorder %s787_s17, 3  ;;  %s1004_s1 = sld [smem:[#allocation14_spill]] }
  0x12   : > { %p497_p13 = scmp.ge.s32.totalorder %s787_s17, 2  ;;  %p567_p0 = scmp.lt.s32.totalorder %s787_s17, 2 }
  0x13   : > { %p880_p12 = pnand %p494_p10, %p136_p11  ;;  %s158_s5 = sshll.u32 %s996_s2, 4  ;;  %s159_s5 = int_to_ptr.vmem [resolvable:$true] %s158_s5 }
  0x14   : > { %p893_p2 = pnand %p567_p0, %p857_p5  ;;  %s789_s7 = smov [#allocation7]  }
  0x15   : > { %p550_p1 = pneg %p880_p12  ;;  %s790_s8 = smov [#allocation8]  }
  0x16   : > { %s33_s9 = sadd.s32 1, %s783_s16  ;;  %s169_s10 = sand.u32 1, %s775_s14  }
  0x17   : > { %s148_s28 = sshll.u32 %s1004_s1, 4  ;;  %p551_p4 = pnand %p550_p1, %p853_p3  ;;  %s149_s28 = int_to_ptr.hbm [resolvable:$true] %s148_s28 }
  0x18   : > { %p35_p6 = scmp.ge.s32.totalorder %s33_s9, 2  ;;  %s498_s11 = sshll.u32 %s169_s10, 3 }
  0x19   : > { %553 = dma.hbm_to_smem (!%p551_p4), %s149_s28, 64, %s789_s7, [#allocation5]  }
  0x1a   : > { %556 = dma.vmem_to_smem (!%p551_p4), %s159_s5, 16, %s790_s8, [#allocation6]  }
  0x1b   : > { %s535_s18 = sshll.u32 %s783_s16, 3  ;;  %s1013_s9 = smov (%p35_p6, %s33_s9), 0 }
  0x1c   : > { %s179_s26 = scalar_lea.hbm %s994_s0, %s535_s18  ;;  %s37_s27 = ssub.s32 %s783_s16, %s1013_s9 }
  0x1d   : > { %s180_s30 = sshll.u32 %s179_s26, 4  ;;  %p40_p5 = scmp.eq.s32.totalorder %s37_s27, 0  ;;  %s181_s30 = int_to_ptr.hbm [resolvable:$true] %s180_s30 }
  0x1e   : > { %s173_s28 = scalar_lea.vmem [#allocation2], %s498_s11  ;;  %s170_s7 = scalar_lea.sflag [#allocation3], %s169_s10 }
  0x1f   : > { %s182_s4 = sshll.u32 %s173_s28, 4  ;;  %s791_s8 = smov 32   ;;  %s183_s4 = int_to_ptr.vmem [resolvable:$true] %s182_s4 }
  0x20   : > { %s912_s5 = scalar_select %p40_p5, %s775_s14, %s42_s20  }
  0x21   : > { %s792_s1 = smov 2   ;;  %194 = sbr.rel (%p880_p12) target bundleno = 105 (0x69), region = 32 }
  0x22   : > { %560 = dma.hbm_to_vmem [thread:$0]  (!%p893_p2), %s181_s30, 128, %s183_s4, %s170_s7, %s791_s8, %s791_s8, %s792_s1  }
  0x23   : > { %s919_s18 = sand.u32 (!%p880_p12), 1, %s771_s13  }
  0x24   : > { %s502_s11 = sshll.u32 (!%p880_p12), %s919_s18, 3  ;;  %s197_s19 = scalar_lea.sflag (!%p880_p12), [#allocation3], %s919_s18 }
  0x25   : > { %s923_s22 = scalar_lea.vmem (!%p880_p12), [#allocation2], %s502_s11 }
  0x26   : > { %750 = dma.done.wait (%p863_p7), %s197_s19, 128  }
  0x27   : > { %752 = vsyncadd (%p863_p7), %s197_s19, 4294967168 }
  0x28   : > { %754 = dma.done.wait (%p853_p3), [#allocation5], 64  }
  0x29   : > { %756 = vsyncadd (%p853_p3), [#allocation5], 4294967232 }
  0x2a   : > { %758 = dma.done.wait (%p853_p3), [#allocation6], 16  }
  0x2b   : > { %760 = vsyncadd (%p853_p3), [#allocation6], 4294967280 }
  0x2c   : > { %216 = sfence }
  0x2d   : > { %s236_s1 = sld [smem:[#allocation7]]  ;;  %v235_v0 = vld [vmem:[%s923_s22] sm:$0x3]  ;;  %v505_v1 = vld [vmem:[%s923_s22 + $0x2] sm:$0x3]  ;;  %s536_s19 = smul.u32 6, %s919_s18 }
  0x2e   : > { %s506_s20 = sld [smem:[#allocation7 + $0x1]]  ;;  %v507_v3 = vld [vmem:[%s923_s22 + $0x4] sm:$0x3]  ;;  %v509_v6 = vld [vmem:[%s923_s22 + $0x6] sm:$0x3] }
  0x2f   : > { %s508_s23 = sld [smem:[#allocation7 + $0x2]]  ;;  %v280_v11 = vld [vmem:[%s923_s22] sm:$0x3]  ;;  %v513_v14 = vld [vmem:[%s923_s22 + $0x2] sm:$0x3] }
  0x30   : > { %s510_s29 = sld [smem:[#allocation7 + $0x3]]  ;;  %v515_v16 = vld [vmem:[%s923_s22 + $0x4] sm:$0x3]  ;;  %v517_v20 = vld [vmem:[%s923_s22 + $0x6] sm:$0x3] }
  0x31   : > { %s938_s6 = sld [smem:[#allocation8]]  ;;  %v323_v27 = vld [vmem:[%s923_s22] sm:$0x3]  ;;  %v523_v30 = vld [vmem:[%s923_s22 + $0x2] sm:$0x3] }
  0x32   : > { %s512_s10 = sld [smem:[#allocation7 + $0x80]]  ;;  %v525_v33 = vld [vmem:[%s923_s22 + $0x4] sm:$0x3]  ;;  %v527_v37 = vld [vmem:[%s923_s22 + $0x6] sm:$0x3]  ;;  %s537_s22 = smul.u32 6, %s779_s15 }
  0x33   : > { %v237_v2 = vstv %s236_s1  ;;  %s514_s21 = sld [smem:[#allocation7 + $0x81]]  ;;  %s234_s1 = scalar_lea.vmem [#allocation9], %s536_s19 }
  0x34   : > { %v238_v4 = vmul.f32 %v237_v2, %v235_v0  ;;  %v242_v5 = vstv %s506_s20  ;;  %s516_s26 = sld [smem:[#allocation7 + $0x82]]  ;;  %s380_s15 = sshll.u32 %s234_s1, 4  ;;  %s381_s15 = int_to_ptr.vmem [resolvable:$true] %s380_s15 }
  0x35   : > { %v243_v7 = vmul.f32 %v505_v1, %v242_v5  ;;  %v248_v8 = vstv %s508_s23  ;;  %s518_s27 = sld [smem:[#allocation7 + $0x83]] }
  0x36   : > { %v249_v9 = vmul.f32 %v507_v3, %v248_v8  ;;  %v254_v10 = vstv %s510_s29  ;;  %s944_s30 = sld [smem:[#allocation8 + $0x1]]  ;;  %s379_s29 = scalar_lea.hbm %s997_s3, %s537_s22 }
  0x37   : > { %v244_v12 = vadd.f32 %v243_v7, %v238_v4  ;;  %v255_v13 = vmul.f32 %v509_v6, %v254_v10  ;;  %s522_s28 = sld [smem:[#allocation7 + $0x100]]  ;;  %v258_v21 = vstv %s938_s6  ;;  %s382_s6 = sshll.u32 %s379_s29, 4  ;;  %s383_s6 = int_to_ptr.hbm [resolvable:$true] %s382_s6 }
  0x38   : > { %v282_v15 = vstv %s512_s10  ;;  %s524_s4 = sld [smem:[#allocation7 + $0x101]]  ;;  %s367_s10 = scalar_lea.sflag [#allocation4], %s919_s18 }
  0x39   : > { %v250_v17 = vadd.f32 %v249_v9, %v244_v12  ;;  %v283_v18 = vmul.f32 %v282_v15, %v280_v11  ;;  %v286_v19 = vstv %s514_s21  ;;  %s526_s7 = sld [smem:[#allocation7 + $0x102]]  ;;  %s711_s21 = sshra.s32 %s383_s6, 4  ;;  %s712_s21 = int_to_ptr.hbm [resolvable:$true] %s711_s21 }
  0x3a   : > { %v287_v22 = vmul.f32 %v513_v14, %v286_v19  ;;  %v291_v23 = vstv %s516_s26  ;;  %s528_s8 = sld [smem:[#allocation7 + $0x103]]  ;;  %s713_s26 = scalar_lea.hbm %s712_s21, 6 }
  0x3b   : > { %v256_v24 = vadd.f32 %v255_v13, %v250_v17  ;;  %v292_v25 = vmul.f32 %v515_v16, %v291_v23  ;;  %v296_v26 = vstv %s518_s27  ;;  %s529_s11 = sld [smem:[#allocation8 + $0x2]]  ;;  %p714_p3 = scmp.ne.s32.totalorder %s712_s21, %s713_s26 }
  0x3c   : > { %v288_v28 = vadd.f32 %v287_v22, %v283_v18  ;;  %v297_v29 = vmul.f32 %v517_v20, %v296_v26  ;;  %v300_v39 = vstv %s944_s30  ;;  %p718_p11 = scmp.lt.s32.totalorder %s712_s21, %s997_s3 }
  0x3d   : > { %v259_v31 = vadd.f32 %v258_v21, %v256_v24  ;;  %v325_v32 = vstv %s522_s28  ;;  %p715_p7 = pnand %p714_p3, %p867_p8  ;;  %s717_s28 = scalar_lea.hbm %s997_s3, 12 }
  0x3e   : > { %v293_v34 = vadd.f32 %v292_v25, %v288_v28  ;;  %v326_v35 = vmul.f32 %v325_v32, %v323_v27  ;;  %v329_v36 = vstv %s524_s4  ;;  %p719_p12 = scmp.lt.s32.totalorder %s717_s28, %s713_s26 }
  0x3f   : > { %v511_v38 = vmul.f32 -1.442695, %v259_v31  ;;  %v330_v40 = vmul.f32 %v523_v30, %v329_v36  ;;  %v334_v41 = vstv %s526_s7  ;;  %p716_p10 = pneg %p715_p7 }
  0x40   : > { %v298_v42 = vadd.f32 %v297_v29, %v293_v34  ;;  %v335_v43 = vmul.f32 %v525_v33, %v334_v41  ;;  %v339_v44 = vstv %s528_s8  ;;  %p720_p0 = por %p719_p12, %p718_p11 }
  0x41   : > { %625 = vpow2.f32 %v511_v38  ;;  %v331_v45 = vadd.f32 %v330_v40, %v326_v35  ;;  %v340_v46 = vmul.f32 %v527_v37, %v339_v44  ;;  %v343_v50 = vstv %s529_s11 }
  0x42   : > { %v301_v47 = vadd.f32 %v300_v39, %v298_v42  ;;  %p721_p1 = pnand %p720_p0, %p716_p10 }
  0x43   : > { %v336_v48 = vadd.f32 %v335_v43, %v331_v45 }
  0x44   : > { %v520_v49 = vmul.f32 -1.442695, %v301_v47 }
  0x45   : > { %v341_v51 = vadd.f32 %v340_v46, %v336_v48 }
  0x46   : > { %627 = vpow2.f32 %v520_v49 }
  0x47   : > { %v626_v52 = vpop.eup %625  ;;  %v344_v53 = vadd.f32 %v343_v50, %v341_v51 }
  0x48   : > { %v263_v54 = vadd.f32 1.0, %v626_v52 }
  0x49   : > { %v530_v55 = vmul.f32 -1.442695, %v344_v53 }
  0x4a   : > { %629 = vrcp.f32 %v263_v54  ;;  %v275_v61 = vand.u32 2147483648, %v263_v54  ;;  %vm269_vm0 = vweird.f32 %v263_v54  ;;  %v273_v0 = vand.u32 2147483647, %v263_v54 }
  0x4b   : > { %631 = vpow2.f32 %v530_v55 }
  0x4c   : > { %v628_v56 = vpop.eup %627  ;;  %v276_v3 = vor.u32 1.1754944e-38, %v275_v61  ;;  %vm274_vm3 = vcmp.eq.f32.partialorder %v273_v0, 8.507059e+37 }
  0x4d   : > { %v305_v57 = vadd.f32 1.0, %v628_v56 }
  0x4f   : > { %633 = vrcp.f32 %v305_v57  ;;  %v317_v6 = vand.u32 2147483648, %v305_v57  ;;  %vm311_vm4 = vweird.f32 %v305_v57  ;;  %v315_v8 = vand.u32 2147483647, %v305_v57 }
  0x50   : > { %v630_v58 = vpop.eup %629 }
  0x51   : > { %v632_v59 = vpop.eup %631  ;;  %v265_v60 = vmul.f32 %v630_v58, %v263_v54  ;;  %vm270_vm1 = vweird.f32 %v630_v58  ;;  %v318_v13 = vor.u32 1.1754944e-38, %v317_v6  ;;  %vm316_vm7 = vcmp.eq.f32.partialorder %v315_v8, 8.507059e+37 }
  0x52   : > { %v348_v62 = vadd.f32 1.0, %v632_v59  ;;  %vm271_vm2 = vmor %vm269_vm0, %vm270_vm1 }
  0x53   : > { %v266_v63 = vsub.f32 1.0, %v265_v60 }
  0x54   : > { %635 = vrcp.f32 %v348_v62  ;;  %v360_v16 = vand.u32 2147483648, %v348_v62  ;;  %vm354_vm8 = vweird.f32 %v348_v62  ;;  %v358_v18 = vand.u32 2147483647, %v348_v62 }
  0x55   : > { %v634_v1 = vpop.eup %633  ;;  %v267_v2 = vmul.f32 %v630_v58, %v266_v63 }
  0x56   : > { %v307_v4 = vmul.f32 %v634_v1, %v305_v57  ;;  %vm312_vm5 = vweird.f32 %v634_v1  ;;  %v361_v22 = vor.u32 1.1754944e-38, %v360_v16  ;;  %vm359_vm11 = vcmp.eq.f32.partialorder %v358_v18, 8.507059e+37 }
  0x57   : > { %v268_v5 = vadd.f32 %v630_v58, %v267_v2  ;;  %vm313_vm6 = vmor %vm311_vm4, %vm312_vm5 }
  0x58   : > { %v308_v7 = vsub.f32 1.0, %v307_v4 }
  0x59   : > { %v272_v9 = vsel %vm271_vm2, %v630_v58, %v268_v5 }
  0x5a   : > { %v636_v10 = vpop.eup %635  ;;  %v277_v11 = vsel %vm274_vm3, %v276_v3, %v272_v9  ;;  %v309_v12 = vmul.f32 %v634_v1, %v308_v7 }
  0x5b   : > { %279 = vst [vmem:[%s234_s1] sm:$0x3] %v277_v11  ;;  %v350_v14 = vmul.f32 %v636_v10, %v348_v62  ;;  %vm355_vm9 = vweird.f32 %v636_v10 }
  0x5c   : > { %v310_v15 = vadd.f32 %v634_v1, %v309_v12  ;;  %vm356_vm10 = vmor %vm354_vm8, %vm355_vm9 }
  0x5d   : > { %v351_v17 = vsub.f32 1.0, %v350_v14 }
  0x5e   : > { %v314_v19 = vsel %vm313_vm6, %v634_v1, %v310_v15 }
  0x5f   : > { %v319_v20 = vsel %vm316_vm7, %v318_v13, %v314_v19  ;;  %v352_v21 = vmul.f32 %v636_v10, %v351_v17 }
  0x60   : > { %521 = vst [vmem:[%s234_s1 + $0x2] sm:$0x3] %v319_v20 }
  0x61   : > { %v353_v23 = vadd.f32 %v636_v10, %v352_v21 }
  0x63   : > { %v357_v24 = vsel %vm356_vm10, %v636_v10, %v353_v23 }
  0x64   : > { %v362_v25 = vsel %vm359_vm11, %v361_v22, %v357_v24 }
  0x65   : > { %531 = vst [vmem:[%s234_s1 + $0x4] sm:$0x3] %v362_v25 }
  0x66   : > { %724 = shalt.err (!%p721_p1)
}
  0x67   : > { %s793_s18 = smov 32   ;;  %s794_s8 = smov 2  }
  0x68   : > { %548 = dma.vmem_to_hbm [thread:$0]  (%p867_p8), %s381_s15, 96, %s383_s6, %s367_s10, %s793_s18, %s793_s18, %s794_s8  }
  0x69 PF: > { %s397_s11 = sand.u32 1, %s767_s12   ;;  %p562_p2 = pnand %p497_p13, %p871_p9 }
  0x6a   : > { %s398_s19 = scalar_lea.sflag [#allocation4], %s397_s11 }
  0x6b   : > { %p563_p4 = pneg %p562_p2 }
  0x6d   : > { %762 = dma.done.wait (%p563_p4), %s398_s19, 96  }
  0x6e   : > { %764 = vsyncadd (%p563_p4), %s398_s19, 4294967200  ;;  %s21_s17 = sadd.s32 1, %s787_s17   ;;  %s1007_s12 = smov %s771_s13 }
  0x6f   : > { %p18_p6 = scmp.ge.s32.totalorder %s21_s17, 4   ;;  %s1008_s13 = smov %s775_s14 }
  0x70   : > { %s1009_s14 = smov %s912_s5  ;;  %s1010_s15 = smov %s783_s16 }
  0x71   : > { %s1011_s16 = smov %s1013_s9  ;;  %20 = sbr.rel (!%p18_p6) target bundleno = 10 (0xa), region = 92 }
  0x76   :  { %404 = vsyncpa [#allocation3], 1 }
  0x77   :  { %406 = vsyncpa [#allocation3 + $0x1], 1 }
  0x78   :  { %407 = vsyncpa [#allocation4], 1 }
  0x79   :  { %409 = vsyncpa [#allocation4 + $0x1], 1 }
  0x7a   :  { %410 = vsyncpa [#allocation5], 1 }
  0x7b   :  { %412 = vsyncpa [#allocation5 + $0x1], 1 }
  0x7c   :  { %413 = vsyncpa [#allocation6], 1 }
  0x7d   :  { %415 = vsyncpa [#allocation6 + $0x1], 1 }

</bundles_post_ra>
